<compile_context>
chip_gen: v6e
topology: v6e:2x2x1
jax: 0.10.0
libtpu: 0.0.40
codegen_flags: <defaults>
</compile_context>

<pallas_src>
import functools

import jax
import jax.numpy as jnp
from jax.experimental import pallas as pl
from jax.experimental.pallas import tpu as pltpu

# ---- module constants (mirror NeuralRenderer.__init__ defaults) -------------
IMG_SIZE = 64          # img_size (small for the example; module default 256)
OFFSET_Z = -1.0        # self.offset_z
NORM_F = 1.0
NORM_Z = 0.0
NORM_F0 = 0.0
CHANGE_PROJ_POINTS = True
N_FACES_TEX = 7774     # self.textures shape from __init__

SUBLANE_TILE = 512     # 512 sublane-rows * 128 lanes = 65,536 vertices / step


# ----------------------------- Pallas kernel ---------------------------------
def _proj_kernel(cam_ref, v_ref, proj_ref, *pp_refs, img_size, change_proj):
    """Perspective projection of one (1, 3, S, 128) vertex tile.

    cam_ref  : SMEM (B, 16) f32, per batch:
               [r00 r01 r02 r10 r11 r12 r20 r21 r22  tx ty tz  f  0 0 0]
    v_ref    : VMEM (1, 3, S, 128)  planes = x, y, z
    proj_ref : VMEM (1, 3, S, 128)  planes = proj_x, proj_y, z'
    pp_refs  : optional VMEM (1, 2, S, 128) fused project_points output
    """
    b = pl.program_id(0)

    # per-batch scalars (SMEM) — negligible once tiles are large
    r00 = cam_ref[b, 0]
    r01 = cam_ref[b, 1]
    r02 = cam_ref[b, 2]
    r10 = cam_ref[b, 3]
    r11 = cam_ref[b, 4]
    r12 = cam_ref[b, 5]
    r20 = cam_ref[b, 6]
    r21 = cam_ref[b, 7]
    r22 = cam_ref[b, 8]
    tx = cam_ref[b, 9]
    ty = cam_ref[b, 10]
    tz = cam_ref[b, 11]
    f = cam_ref[b, 12]

    # full (S, 128) coordinate planes -> full vregs, unmasked loads/stores
    x = v_ref[0, 0]
    y = v_ref[0, 1]
    z = v_ref[0, 2]

    # rotation (quaternion as 3x3 matrix) + translation
    xr = r00 * x + r01 * y + r02 * z + tx
    yr = r10 * x + r11 * y + r12 * z + ty
    zr = r20 * x + r21 * y + r22 * z + (tz + OFFSET_Z)

    inv_z = 1.0 / zr                      # exact divide (memory-bound anyway)
    px = (f * xr) * inv_z
    py = (f * yr) * inv_z

    proj_ref[0, 0] = px
    proj_ref[0, 1] = py
    proj_ref[0, 2] = zr

    if pp_refs:                           # fused project_points epilogue
        (pp_ref,) = pp_refs
        half = 0.5 * img_size
        ppx = (px + 1.0) * half
        ppy = (py + 1.0) * half
        if change_proj:
            ppy = img_size - ppy
        pp_ref[0, 0] = ppx
        pp_ref[0, 1] = ppy


# ------------------------------ JAX glue --------------------------------------
def _quat_to_rotmat(q):
    """(B, 4) quaternion (w, x, y, z) -> (B, 3, 3) rotation matrix."""
    w, x, y, z = q[:, 0], q[:, 1], q[:, 2], q[:, 3]
    r = jnp.stack(
        [
            w * w + x * x - y * y - z * z, 2 * (x * y - w * z), 2 * (x * z + w * y),
            2 * (x * y + w * z), w * w - x * x + y * y - z * z, 2 * (y * z - w * x),
            2 * (x * z - w * y), 2 * (y * z + w * x), w * w - x * x - y * y + z * z,
        ],
        axis=-1,
    )
    return r.reshape(-1, 3, 3)


def _pack_cams(cams):
    """cams: (B, 7) = [f, tx, ty, quat(w,x,y,z)] -> (B, 16) scalar table."""
    b = cams.shape[0]
    rot = _quat_to_rotmat(cams[:, -4:]).reshape(b, 9)
    f = (NORM_F0 + NORM_F * cams[:, 0])[:, None]
    tx = cams[:, 1:2]
    ty = cams[:, 2:3]
    tz = jnp.full((b, 1), NORM_Z, dtype=cams.dtype)
    pad = jnp.zeros((b, 3), dtype=cams.dtype)
    return jnp.concatenate([rot, tx, ty, tz, f, pad], axis=1).astype(jnp.float32)


@functools.partial(
    jax.jit, static_argnames=("img_size", "compute_pp", "change_proj")
)
def perspective_proj_withz_pallas(
    vertices, cams, *, img_size=0.0, compute_pp=False, change_proj=True
):
    """vertices: (B, N, 3) f32, cams: (B, 7) f32.

    Returns projected verts (B, N, 3); if compute_pp also returns the fused
    project_points pixels (B, N, 2).
    """
    b, n, _ = vertices.shape

    # tile geometry: vertex axis on (sublanes, lanes) = (S, 128)
    n_blk_raw = pl.cdiv(n, 128)
    if n_blk_raw <= SUBLANE_TILE:
        s = int(n_blk_raw)            # whole N axis in one block (full-dim ok)
        n_blk = s
    else:
        s = SUBLANE_TILE              # multiple of 8
        n_blk = pl.cdiv(n_blk_raw, s) * s
    n_pad = n_blk * 128

    # (B, N, 3) -> (B, 3, n_blk, 128); one XLA transpose+pad pass (API keeps
    # the PyTorch (B, N, 3) contract, so this round trip is the minimum).
    v = jnp.transpose(vertices.astype(jnp.float32), (0, 2, 1))       # (B, 3, N)
    v = jnp.pad(v, ((0, 0), (0, 0), (0, n_pad - n)))
    v = v.reshape(b, 3, n_blk, 128)

    cam_packed = _pack_cams(cams.astype(jnp.float32))

    in_specs = [pl.BlockSpec((1, 3, s, 128), lambda bi, ni, cam: (bi, 0, ni, 0))]
    if compute_pp:
        out_shape = (
            jax.ShapeDtypeStruct((b, 3, n_blk, 128), jnp.float32),
            jax.ShapeDtypeStruct((b, 2, n_blk, 128), jnp.float32),
        )
        out_specs = (
            pl.BlockSpec((1, 3, s, 128), lambda bi, ni, cam: (bi, 0, ni, 0)),
            pl.BlockSpec((1, 2, s, 128), lambda bi, ni, cam: (bi, 0, ni, 0)),
        )
    else:
        out_shape = jax.ShapeDtypeStruct((b, 3, n_blk, 128), jnp.float32)
        out_specs = pl.BlockSpec((1, 3, s, 128), lambda bi, ni, cam: (bi, 0, ni, 0))

    kernel = functools.partial(
        _proj_kernel, img_size=float(img_size), change_proj=bool(change_proj)
    )

    outs = pl.pallas_call(
        kernel,
        out_shape=out_shape,
        grid_spec=pltpu.PrefetchScalarGridSpec(
            num_scalar_prefetch=1,                 # cam table lands in SMEM
            grid=(b, n_blk // s),
            in_specs=in_specs,
            out_specs=out_specs,
        ),
        compiler_params=pltpu.CompilerParams(
            dimension_semantics=("parallel", "parallel")
        ),
    )(cam_packed, v)

    if compute_pp:
        proj4, pp4 = outs
    else:
        proj4 = outs

    proj = jnp.transpose(proj4.reshape(b, 3, n_pad)[:, :, :n], (0, 2, 1))
    if compute_pp:
        pp = jnp.transpose(pp4.reshape(b, 2, n_pad)[:, :, :n], (0, 2, 1))
        return proj, pp
    return proj


class NeuralRendererJAX:
    """JAX/Pallas port of NeuralRenderer (projection path)."""

    def __init__(self, img_size=IMG_SIZE, change_proj_points=CHANGE_PROJ_POINTS):
        self.img_size = img_size
        self.offset_z = OFFSET_Z
        self.change_proj_points = change_proj_points
        # self.textures from __init__: ones(7774,4,4,4,3) * [0,172,223]/255
        color = jnp.array([0.0, 172.0, 223.0], dtype=jnp.float32) / 255.0
        self.textures = jnp.ones((N_FACES_TEX, 4, 4, 4, 3), jnp.float32) * color

    def project_points(self, verts, cams):
        # pixel-space points computed inside the kernel epilogue (fused)
        _, pp = perspective_proj_withz_pallas(
            verts, cams,
            img_size=float(self.img_size),
            compute_pp=True,
            change_proj=self.change_proj_points,
        )
        return pp

    def forward(self, vertices, faces, cams, textures=None):
        verts = perspective_proj_withz_pallas(vertices, cams)
        if textures is None:
            textures = jnp.broadcast_to(
                self.textures[None], (verts.shape[0],) + self.textures.shape
            )
        # TODO(synk): differentiable rasterization (renderer.render_rgb /
        # render_silhouettes from the external neural_renderer library) has no
        # clean Pallas equivalent; returning projected verts + textures instead.
        return verts, textures


# ------------------------------- reference ------------------------------------
def _proj_ref(vertices, cams):
    rot = _quat_to_rotmat(cams[:, -4:])
    xr = jnp.einsum("bij,bnj->bni", rot, vertices)
    f = NORM_F0 + NORM_F * cams[:, 0]
    trans = jnp.stack(
        [cams[:, 1], cams[:, 2], jnp.full_like(cams[:, 1], NORM_Z)], axis=-1
    )
    xt = xr + trans[:, None, :]
    z = xt[:, :, 2] + OFFSET_Z
    px = f[:, None] * xt[:, :, 0] / z
    py = f[:, None] * xt[:, :, 1] / z
    return jnp.stack([px, py, z], axis=-1)


def _pp_ref(vertices, cams, img_size):
    proj = _proj_ref(vertices, cams)
    pp = (proj[:, :, :2] + 1.0) * 0.5 * img_size
    return jnp.stack([pp[:, :, 0], img_size - pp[:, :, 1]], axis=-1)


if __name__ == "__main__":
    key = jax.random.PRNGKey(0)
    kv, kq, kf, kt, kfc, kv2 = jax.random.split(key, 6)

    B, N, F = 2, 256, 512
    vertices = 0.3 * jax.random.normal(kv, (B, N, 3), jnp.float32)
    quat = jax.random.normal(kq, (B, 4), jnp.float32)
    quat = quat / jnp.linalg.norm(quat, axis=-1, keepdims=True)
    focal = 1.0 + 0.1 * jax.random.normal(kf, (B, 1), jnp.float32)
    trans = 0.05 * jax.random.normal(kt, (B, 2), jnp.float32)
    cams = jnp.concatenate([focal, trans, quat], axis=1)          # (B, 7)
    faces = jax.random.randint(kfc, (B, F, 3), 0, N, jnp.int32)   # unused (rasterizer TODO)

    model = NeuralRendererJAX(img_size=IMG_SIZE)

    # forward path
    verts_proj, tex = model.forward(vertices, faces, cams)
    verts_proj = jax.block_until_ready(verts_proj)
    ref = _proj_ref(vertices, cams)
    assert verts_proj.shape == (B, N, 3)
    assert jnp.allclose(verts_proj, ref, rtol=1e-5, atol=1e-5), "proj mismatch"

    # fused project_points path
    pp = jax.block_until_ready(model.project_points(vertices, cams))
    assert pp.shape == (B, N, 2)
    assert jnp.allclose(pp, _pp_ref(vertices, cams, IMG_SIZE),
                        rtol=1e-5, atol=1e-4), "project_points mismatch"

    # non-multiple-of-128 vertex count (exercises padding + slice-off)
    v2 = 0.3 * jax.random.normal(kv2, (B, 300, 3), jnp.float32)
    out2 = jax.block_until_ready(perspective_proj_withz_pallas(v2, cams))
    assert jnp.allclose(out2, _proj_ref(v2, cams), rtol=1e-5, atol=1e-5), \
        "padded-shape mismatch"

    print("KERNEL_OK")
</pallas_src>

<mosaic_0001>
module attributes {stable_mosaic.version = 11 : i64} {
  func.func @_proj_kernel(%arg0: i32, %arg1: i32, %arg2: memref<2x16xf32, #tpu.memory_space<smem>>, %arg3: memref<1x3x2x128xf32, #tpu.memory_space<vmem>>, %arg4: memref<1x3x2x128xf32, #tpu.memory_space<vmem>>) attributes {dimension_semantics = [#tpu.dimension_semantics<parallel>, #tpu.dimension_semantics<parallel>], iteration_bounds = array<i64: 2, 1>, scalar_prefetch = 1 : i64, scratch_operands = 0 : i64, tpu.core_type = #tpu.core_type<tc>, window_params = [{transform_indices = @transform_0, window_bounds = array<i64: 1, 3, 2, 128>}, {transform_indices = @transform_1, window_bounds = array<i64: 1, 3, 2, 128>}]} {
    %0 = arith.index_cast %arg0 : i32 to index
    %c0 = arith.constant 0 : index
    %1 = memref.load %arg2[%0, %c0] : memref<2x16xf32, #tpu.memory_space<smem>>
    %2 = arith.index_cast %arg0 : i32 to index
    %c1 = arith.constant 1 : index
    %3 = memref.load %arg2[%2, %c1] : memref<2x16xf32, #tpu.memory_space<smem>>
    %4 = arith.index_cast %arg0 : i32 to index
    %c2 = arith.constant 2 : index
    %5 = memref.load %arg2[%4, %c2] : memref<2x16xf32, #tpu.memory_space<smem>>
    %6 = arith.index_cast %arg0 : i32 to index
    %c3 = arith.constant 3 : index
    %7 = memref.load %arg2[%6, %c3] : memref<2x16xf32, #tpu.memory_space<smem>>
    %8 = arith.index_cast %arg0 : i32 to index
    %c4 = arith.constant 4 : index
    %9 = memref.load %arg2[%8, %c4] : memref<2x16xf32, #tpu.memory_space<smem>>
    %10 = arith.index_cast %arg0 : i32 to index
    %c5 = arith.constant 5 : index
    %11 = memref.load %arg2[%10, %c5] : memref<2x16xf32, #tpu.memory_space<smem>>
    %12 = arith.index_cast %arg0 : i32 to index
    %c6 = arith.constant 6 : index
    %13 = memref.load %arg2[%12, %c6] : memref<2x16xf32, #tpu.memory_space<smem>>
    %14 = arith.index_cast %arg0 : i32 to index
    %c7 = arith.constant 7 : index
    %15 = memref.load %arg2[%14, %c7] : memref<2x16xf32, #tpu.memory_space<smem>>
    %16 = arith.index_cast %arg0 : i32 to index
    %c8 = arith.constant 8 : index
    %17 = memref.load %arg2[%16, %c8] : memref<2x16xf32, #tpu.memory_space<smem>>
    %18 = arith.index_cast %arg0 : i32 to index
    %c9 = arith.constant 9 : index
    %19 = memref.load %arg2[%18, %c9] : memref<2x16xf32, #tpu.memory_space<smem>>
    %20 = arith.index_cast %arg0 : i32 to index
    %c10 = arith.constant 10 : index
    %21 = memref.load %arg2[%20, %c10] : memref<2x16xf32, #tpu.memory_space<smem>>
    %22 = arith.index_cast %arg0 : i32 to index
    %c11 = arith.constant 11 : index
    %23 = memref.load %arg2[%22, %c11] : memref<2x16xf32, #tpu.memory_space<smem>>
    %24 = arith.index_cast %arg0 : i32 to index
    %c12 = arith.constant 12 : index
    %25 = memref.load %arg2[%24, %c12] : memref<2x16xf32, #tpu.memory_space<smem>>
    %c0_0 = arith.constant 0 : index
    %c0_1 = arith.constant 0 : index
    %c0_2 = arith.constant 0 : index
    %c0_3 = arith.constant 0 : index
    %26 = vector.load %arg3[%c0_0, %c0_1, %c0_2, %c0_3] : memref<1x3x2x128xf32, #tpu.memory_space<vmem>>, vector<1x1x2x128xf32>
    %27 = vector.shape_cast %26 : vector<1x1x2x128xf32> to vector<2x128xf32>
    %c0_4 = arith.constant 0 : index
    %c1_5 = arith.constant 1 : index
    %c0_6 = arith.constant 0 : index
    %c0_7 = arith.constant 0 : index
    %28 = vector.load %arg3[%c0_4, %c1_5, %c0_6, %c0_7] : memref<1x3x2x128xf32, #tpu.memory_space<vmem>>, vector<1x1x2x128xf32>
    %29 = vector.shape_cast %28 : vector<1x1x2x128xf32> to vector<2x128xf32>
    %c0_8 = arith.constant 0 : index
    %c2_9 = arith.constant 2 : index
    %c0_10 = arith.constant 0 : index
    %c0_11 = arith.constant 0 : index
    %30 = vector.load %arg3[%c0_8, %c2_9, %c0_10, %c0_11] : memref<1x3x2x128xf32, #tpu.memory_space<vmem>>, vector<1x1x2x128xf32>
    %31 = vector.shape_cast %30 : vector<1x1x2x128xf32> to vector<2x128xf32>
    %32 = vector.broadcast %1 : f32 to vector<2x128xf32>
    %33 = arith.mulf %32, %27 : vector<2x128xf32>
    %34 = vector.broadcast %3 : f32 to vector<2x128xf32>
    %35 = arith.mulf %34, %29 : vector<2x128xf32>
    %36 = arith.addf %33, %35 : vector<2x128xf32>
    %37 = vector.broadcast %5 : f32 to vector<2x128xf32>
    %38 = arith.mulf %37, %31 : vector<2x128xf32>
    %39 = arith.addf %36, %38 : vector<2x128xf32>
    %40 = vector.broadcast %19 : f32 to vector<2x128xf32>
    %41 = arith.addf %39, %40 : vector<2x128xf32>
    %42 = vector.broadcast %7 : f32 to vector<2x128xf32>
    %43 = arith.mulf %42, %27 : vector<2x128xf32>
    %44 = vector.broadcast %9 : f32 to vector<2x128xf32>
    %45 = arith.mulf %44, %29 : vector<2x128xf32>
    %46 = arith.addf %43, %45 : vector<2x128xf32>
    %47 = vector.broadcast %11 : f32 to vector<2x128xf32>
    %48 = arith.mulf %47, %31 : vector<2x128xf32>
    %49 = arith.addf %46, %48 : vector<2x128xf32>
    %50 = vector.broadcast %21 : f32 to vector<2x128xf32>
    %51 = arith.addf %49, %50 : vector<2x128xf32>
    %52 = vector.broadcast %13 : f32 to vector<2x128xf32>
    %53 = arith.mulf %52, %27 : vector<2x128xf32>
    %54 = vector.broadcast %15 : f32 to vector<2x128xf32>
    %55 = arith.mulf %54, %29 : vector<2x128xf32>
    %56 = arith.addf %53, %55 : vector<2x128xf32>
    %57 = vector.broadcast %17 : f32 to vector<2x128xf32>
    %58 = arith.mulf %57, %31 : vector<2x128xf32>
    %59 = arith.addf %56, %58 : vector<2x128xf32>
    %cst = arith.constant -1.000000e+00 : f32
    %60 = arith.addf %23, %cst : f32
    %61 = vector.broadcast %60 : f32 to vector<2x128xf32>
    %62 = arith.addf %59, %61 : vector<2x128xf32>
    %cst_12 = arith.constant 1.000000e+00 : f32
    %63 = vector.broadcast %cst_12 : f32 to vector<2x128xf32>
    %64 = arith.divf %63, %62 : vector<2x128xf32>
    %65 = vector.broadcast %25 : f32 to vector<2x128xf32>
    %66 = arith.mulf %65, %41 : vector<2x128xf32>
    %67 = arith.mulf %66, %64 : vector<2x128xf32>
    %68 = vector.broadcast %25 : f32 to vector<2x128xf32>
    %69 = arith.mulf %68, %51 : vector<2x128xf32>
    %70 = arith.mulf %69, %64 : vector<2x128xf32>
    %c0_13 = arith.constant 0 : index
    %c0_14 = arith.constant 0 : index
    %c0_15 = arith.constant 0 : index
    %c0_16 = arith.constant 0 : index
    %71 = vector.load %arg4[%c0_13, %c0_14, %c0_15, %c0_16] : memref<1x3x2x128xf32, #tpu.memory_space<vmem>>, vector<1x1x2x128xf32>
    %72 = vector.shape_cast %71 : vector<1x1x2x128xf32> to vector<2x128xf32>
    %73 = vector.shape_cast %67 : vector<2x128xf32> to vector<1x1x2x128xf32>
    tpu.vector_store %arg4[%c0_13, %c0_14, %c0_15, %c0_16], %73 {strides = array<i32>} : memref<1x3x2x128xf32, #tpu.memory_space<vmem>>, vector<1x1x2x128xf32>,
    %c0_17 = arith.constant 0 : index
    %c1_18 = arith.constant 1 : index
    %c0_19 = arith.constant 0 : index
    %c0_20 = arith.constant 0 : index
    %74 = vector.load %arg4[%c0_17, %c1_18, %c0_19, %c0_20] : memref<1x3x2x128xf32, #tpu.memory_space<vmem>>, vector<1x1x2x128xf32>
    %75 = vector.shape_cast %74 : vector<1x1x2x128xf32> to vector<2x128xf32>
    %76 = vector.shape_cast %70 : vector<2x128xf32> to vector<1x1x2x128xf32>
    tpu.vector_store %arg4[%c0_17, %c1_18, %c0_19, %c0_20], %76 {strides = array<i32>} : memref<1x3x2x128xf32, #tpu.memory_space<vmem>>, vector<1x1x2x128xf32>,
    %c0_21 = arith.constant 0 : index
    %c2_22 = arith.constant 2 : index
    %c0_23 = arith.constant 0 : index
    %c0_24 = arith.constant 0 : index
    %77 = vector.load %arg4[%c0_21, %c2_22, %c0_23, %c0_24] : memref<1x3x2x128xf32, #tpu.memory_space<vmem>>, vector<1x1x2x128xf32>
    %78 = vector.shape_cast %77 : vector<1x1x2x128xf32> to vector<2x128xf32>
    %79 = vector.shape_cast %62 : vector<2x128xf32> to vector<1x1x2x128xf32>
    tpu.vector_store %arg4[%c0_21, %c2_22, %c0_23, %c0_24], %79 {strides = array<i32>} : memref<1x3x2x128xf32, #tpu.memory_space<vmem>>, vector<1x1x2x128xf32>,
    return
  }
  func.func @transform_0(%arg0: i32, %arg1: i32, %arg2: memref<2x16xf32, #tpu.memory_space<smem>>) -> (i32, i32, i32, i32) {
    %c0_i32 = arith.constant 0 : i32
    %c0_i32_0 = arith.constant 0 : i32
    %c0_i32_1 = arith.constant 0 : i32
    return %arg0, %c0_i32, %arg1, %c0_i32_0 : i32, i32, i32, i32
  }
  func.func @transform_1(%arg0: i32, %arg1: i32, %arg2: memref<2x16xf32, #tpu.memory_space<smem>>) -> (i32, i32, i32, i32) {
    %c0_i32 = arith.constant 0 : i32
    %c0_i32_0 = arith.constant 0 : i32
    %c0_i32_1 = arith.constant 0 : i32
    return %arg0, %c0_i32, %arg1, %c0_i32_0 : i32, i32, i32, i32
  }
}

</mosaic_0001>

<bundles_post_ra>
// kernel: perspective_proj_withz_pallas.1
= control target key start
LH: loop header
LB: loop body
LE: loop exit
PB: predicated region body
PF: predicated region fallthrough
CT: control target
= control target key end

     0   :  { %s484_s0 = inlined_call_operand.vmem [shape: f32[2,16], index: 0, kind: input, shape index: {}]   ;;  %s485_s1 = inlined_call_operand.vmem [shape: f32[2,3,2,128], index: 1, kind: input, shape index: {}]   ;;  %s486_s2 = inlined_call_operand.vmem [shape: f32[2,3,2,128], index: 2, kind: output, shape index: {}]  }
   0x1   :  { %s7_s11 = sshll.u32 %s484_s0, 4  ;;  %s8_s11 = int_to_ptr.vmem [resolvable:$true] %s7_s11 }
   0x2   :  { %s354_s12 = scalar_lea.vmem %s8_s11, 32  ;;  %p359_p1 = scmp.lt.s32.totalorder %s8_s11, %s8_s11 }
   0x3   :  { %p355_p0 = scmp.ne.s32.totalorder %s8_s11, %s354_s12  ;;  %p360_p2 = scmp.lt.s32.totalorder %s354_s12, %s354_s12 }
   0x5   :  { %p361_p3 = por %p360_p2, %p359_p1 }
   0x7   :  { %p362_p4 = pnand %p361_p3, %p355_p0 }
   0x9   :  { %365 = shalt.err (!%p362_p4)  }
   0xa   :  { %s392_s13 = smov [#allocation3]  }
   0xb   :  { %10 = dma.vmem_to_smem %s8_s11, 32, %s392_s13, [#allocation2] }
   0xc   :  { %378 = dma.done.wait [#allocation2], 32 }
   0xd   :  { %379 = vsyncadd [#allocation2], 4294967264 }
   0xe   :  { %12 = sfence }
   0xf   :  { %s411_s14 = smov 0   ;;  %s413_s15 = smov 0  }
  0x10   :  { %s415_s16 = smov 0  }
  0x11 LB: > { %s30_s0 = sadd.s32 1, %s386_s15  ;;  %p316_p5 = scmp.ge.s32.totalorder %s390_s16, 1  ;;  %s390_s16 = sphi %s415_s16, %s18_s16   ;;  %s386_s15 = sphi %s413_s15, %s488_s15   ;;  %s382_s14 = sphi %s411_s14, %s487_s14  }
  0x12   : > { %p32_p6 = scmp.ge.s32.totalorder %s30_s0, 2  ;;  %p113_p7 = scmp.lt.s32.totalorder %s390_s16, 3 }
  0x14   : > { %s490_s0 = smov (%p32_p6, %s30_s0), 0  ;;  %p114_p8 = pnand %p316_p5, %p113_p7 }
  0x15   : > { %p139_p9 = scmp.lt.s32.totalorder (!%p114_p8), %s382_s14, 1  ;;  %s429_s17 = sshll.u32 (!%p114_p8), %s382_s14, 7 }
  0x16   : > { %117 = sbr.rel (%p114_p8) target bundleno = 62 (0x3e), region = 24  ;;  %s157_s18 = sadd.s32 (!%p114_p8), 1, %s429_s17 }
  0x17   : > { %s435_s19 = sld [smem:[#allocation3 + %s429_s17]] (!%p114_p8)  ;;  %s159_s20 = sadd.s32 (!%p114_p8), 2, %s429_s17 }
  0x18   : > { %s438_s21 = sld [smem:[#allocation3 + %s157_s18]] (!%p114_p8)  ;;  %s161_s22 = sadd.s32 (!%p114_p8), 3, %s429_s17 }
  0x19   : > { %s163_s23 = sadd.s32 (!%p114_p8), 4, %s429_s17  ;;  %s443_s25 = sld [smem:[#allocation3 + %s159_s20]] (!%p114_p8) }
  0x1a   : > { %s445_s26 = sld [smem:[#allocation3 + %s161_s22]] (!%p114_p8)  ;;  %s167_s27 = sadd.s32 (!%p114_p8), 6, %s429_s17 }
  0x1b   : > { %s492_s14 = smov (!%p139_p9, %s382_s14), 1  ;;  %s448_s28 = sld [smem:[#allocation3 + %s163_s23]] }
  0x1c   : > { %s326_s24 = smul.u32 6, %s492_s14  ;;  %s169_s29 = sadd.s32 7, %s429_s17 }
  0x1d   : > { %s168_s30 = sld [smem:[#allocation3 + %s167_s27]]  ;;  %s171_s3 = sadd.s32 8, %s429_s17  ;;  %v186_v3 = vstv %s435_s19 }
  0x1e   : > { %s146_s6 = scalar_lea.vmem %s485_s1, %s326_s24  ;;  %s170_s7 = sld [smem:[#allocation3 + %s169_s29]]  ;;  %v188_v4 = vstv %s438_s21 }
  0x1f   : > { %s172_s8 = sld [smem:[#allocation3 + %s171_s3]]  ;;  %s177_s9 = sadd.s32 11, %s429_s17  ;;  %v181_v0 = vld [vmem:[%s146_s6] sm:$0x3]  ;;  %v320_v1 = vld [vmem:[%s146_s6 + $0x2] sm:$0x3]  ;;  %v191_v15 = vstv %s443_s25 }
  0x20   : > { %s458_s10 = sld [smem:[#allocation3 + %s177_s9]]  ;;  %s165_s11 = sadd.s32 5, %s429_s17  ;;  %v321_v2 = vld [vmem:[%s146_s6 + $0x4] sm:$0x3]  ;;  %v196_v6 = vstv %s445_s26  ;;  %v187_v12 = vmul.f32 %v186_v3, %v181_v0  ;;  %v189_v13 = vmul.f32 %v320_v1, %v188_v4 }
  0x21   : > { %s173_s12 = sadd.s32 9, %s429_s17  ;;  %s166_s13 = sld [smem:[#allocation3 + %s165_s11]]  ;;  %v198_v7 = vstv %s448_s28  ;;  %v197_v16 = vmul.f32 %v196_v6, %v181_v0  ;;  %v192_v22 = vmul.f32 %v321_v2, %v191_v15 }
  0x22   : > { %s175_s18 = sadd.s32 10, %s429_s17  ;;  %s174_s20 = sld [smem:[#allocation3 + %s173_s12]]  ;;  %v199_v17 = vmul.f32 %v320_v1, %v198_v7  ;;  %v190_v23 = vadd.f32 %v189_v13, %v187_v12 }
  0x23   : > { %v206_v5 = vstv %s168_s30  ;;  %s176_s21 = sld [smem:[#allocation3 + %s175_s18]]  ;;  %s179_s22 = sadd.s32 12, %s429_s17 }
  0x24   : > { %v207_v8 = vmul.f32 %v206_v5, %v181_v0  ;;  %v208_v9 = vstv %s170_s7  ;;  %s154_s27 = scalar_lea.vmem %s486_s2, %s326_s24  ;;  %v200_v25 = vadd.f32 %v199_v17, %v197_v16  ;;  %s180_s25 = sld [smem:[#allocation3 + %s179_s22]]  ;;  %v193_v27 = vadd.f32 %v192_v22, %v190_v23 }
  0x25   : > { %v209_v10 = vmul.f32 %v320_v1, %v208_v9  ;;  %v211_v11 = vstv %s172_s8 }
  0x26   : > { %v212_v14 = vmul.f32 %v321_v2, %v211_v11  ;;  %s214_s19 = sadd.f32 -1.0, %s458_s10 }
  0x27   : > { %v210_v18 = vadd.f32 %v209_v10, %v207_v8  ;;  %v201_v21 = vstv %s166_s13 }
  0x28   : > { %v215_v20 = vstv %s214_s19  ;;  %v202_v26 = vmul.f32 %v321_v2, %v201_v21  ;;  %v194_v29 = vstv %s174_s20 }
  0x29   : > { %v213_v19 = vadd.f32 %v212_v14, %v210_v18  ;;  %v204_v30 = vstv %s176_s21  ;;  %v195_v31 = vadd.f32 %v194_v29, %v193_v27 }
  0x2a   : > { %v203_v28 = vadd.f32 %v202_v26, %v200_v25  ;;  %v219_v33 = vstv %s180_s25 }
  0x2b   : > { %v216_v24 = vadd.f32 %v215_v20, %v213_v19  ;;  %v220_v34 = vmul.f32 %v219_v33, %v195_v31 }
  0x2c   : > { %v205_v32 = vadd.f32 %v204_v30, %v203_v28 }
  0x2d   : > { %352 = vrcp.f32 %v216_v24  ;;  %323 = vst [vmem:[%s154_s27 + $0x4] sm:$0x3] %v216_v24 }
  0x2e   : > { %v222_v35 = vmul.f32 %v219_v33, %v205_v32 }
  0x3a   : > { %v353_v36 = vpop.eup %352 }
  0x3b   : > { %v221_v37 = vmul.f32 %v353_v36, %v220_v34  ;;  %v223_v38 = vmul.f32 %v353_v36, %v222_v35 }
  0x3d   : > { %224 = vst [vmem:[%s154_s27] sm:$0x3] %v221_v37  ;;  %322 = vst [vmem:[%s154_s27 + $0x2] sm:$0x3] %v223_v38 }
  0x3e PF: > { %s18_s16 = sadd.s32 1, %s390_s16   ;;  %s487_s14 = smov %s386_s15 }
  0x3f   : > { %p15_p10 = scmp.ge.s32.totalorder %s18_s16, 4   ;;  %s488_s15 = smov %s490_s0 }
  0x41   :  { %17 = sbr.rel (!%p15_p10) target bundleno = 17 (0x11), region = 58 }

</bundles_post_ra>
